<compile_context>
chip_gen: v7x
topology: tpu7x:2x2x1
jax: 0.10.0
libtpu: 0.0.40
codegen_flags: <defaults>
</compile_context>

<pallas_src>
import functools
import math

import jax
import jax.numpy as jnp
from jax.experimental import pallas as pl
from jax.experimental.pallas import tpu as pltpu

EPS = 1e-6


def _tile_budget_bytes():
    """Per-input-tile byte budget, chosen per TPU generation."""
    try:
        kind = jax.devices()[0].device_kind.lower()
    except Exception:
        kind = ""
    if "v7" in kind:
        return 4 << 20   # 3.2 TB/s HBM: large tiles to amortize per-step overhead
    if "v6" in kind or "trillium" in kind:
        return 2 << 20   # ~1.3 TB/s
    return 1 << 20       # v5e & unknown: stay well inside 16 MiB scoped VMEM


def _layernorm_kernel_packed(params_ref, m_ref, x_ref, o_ref, *, h):
    """Packed lane-dense path: each 128-wide row holds 128//h original rows.

    params_ref: (2,) f32 in SMEM -> [alpha/eps, bias] (resident for the call).
    m_ref:      (128, 128) f32 block-diagonal ones matrix (resident in VMEM).
    x_ref/o_ref:(tr, 128) tiles in VMEM.
    """
    x = x_ref[...].astype(jnp.float32)
    m = m_ref[...]

    # Segmented reduce + broadcast on the MXU (idle in this HBM-bound kernel):
    # every lane receives its group's sum, so all VPU work stays (tr, 128).
    group_sum = jnp.dot(x, m, preferred_element_type=jnp.float32,
                        precision=jax.lax.Precision.HIGHEST)
    mean = group_sum * jnp.float32(1.0 / h)
    diff = x - mean
    group_ss = jnp.dot(diff * diff, m, preferred_element_type=jnp.float32,
                       precision=jax.lax.Precision.HIGHEST)

    # torch.std default is unbiased (ddof = 1); h == 1 -> NaN like torch.
    var = group_ss * jnp.float32(1.0 / max(h - 1, 1))
    inv_std = jax.lax.rsqrt(var)                        # EUP slot, no divide

    scale = params_ref[0]                               # alpha / eps (host-folded)
    bias = params_ref[1]
    o_ref[...] = (diff * (inv_std * scale) + bias).astype(o_ref.dtype)


def _layernorm_kernel_plain(params_ref, x_ref, o_ref, *, h, width):
    """Fallback path: last dim padded to `width` (multiple of 128), no packing."""
    x = x_ref[...].astype(jnp.float32)
    if width > h:
        lane = jax.lax.broadcasted_iota(jnp.int32, x.shape, 1)
        valid = lane < h
        xs = jnp.where(valid, x, 0.0)
    else:
        xs = x
    mean = jnp.sum(xs, axis=-1, keepdims=True) * jnp.float32(1.0 / h)
    diff = x - mean
    dm = jnp.where(valid, diff, 0.0) if width > h else diff
    var = jnp.sum(dm * dm, axis=-1, keepdims=True) * jnp.float32(1.0 / max(h - 1, 1))
    inv_std = jax.lax.rsqrt(var)
    out = diff * (inv_std * params_ref[0]) + params_ref[1]
    # Padded lanes hold don't-care values; they are sliced off on the host.
    o_ref[...] = out.astype(o_ref.dtype)


def layer_normalization(x, alpha, bias, *, eps=EPS):
    """Pallas TPU implementation of the LayerNormalization forward pass."""
    orig_shape = x.shape
    h = orig_shape[-1]
    rows = math.prod(orig_shape[:-1]) if len(orig_shape) > 1 else 1
    dtype = x.dtype
    itemsize = jnp.dtype(dtype).itemsize
    row_align = max(8, 32 // itemsize)      # sublane granule: 8 / 16 / 32 for 4 / 2 / 1 B

    x2 = x.reshape(rows, h)

    # --- layout: pack rows into 128 lanes when possible, else pad the lanes ---
    if 1 < h < 128 and 128 % h == 0:
        g = 128 // h
        pad_rows = (-rows) % g
        if pad_rows:
            x2 = jnp.concatenate([x2, jnp.zeros((pad_rows, h), dtype)], axis=0)
        packed_rows = (rows + pad_rows) // g
        width = 128
        x2 = x2.reshape(packed_rows, width)
        pad_lanes = 0
    else:
        g = 1
        width = max(128, ((h + 127) // 128) * 128)
        pad_lanes = width - h
        if pad_lanes:
            x2 = jnp.pad(x2, ((0, 0), (0, pad_lanes)))
        packed_rows = rows
        pad_rows = 0

    # --- tile selection (generation- & dtype-aware) ----------------------------
    bytes_per_row = width * itemsize
    tile_budget = _tile_budget_bytes()
    tr = min(packed_rows, max(1, tile_budget // bytes_per_row))
    # Target >= 8 grid steps (>= 4 per TensorCore on v7x) so double-buffering
    # actually hides DMA instead of exposing the first load / last writeback.
    target_steps = 8
    if packed_rows >= target_steps * row_align:
        tr = min(tr, pl.cdiv(packed_rows, target_steps))
    if tr < packed_rows:
        tr = max(row_align, (tr // row_align) * row_align)
    else:
        tr = packed_rows                    # full-extent block is always legal
    grid = (pl.cdiv(packed_rows, tr),)

    # --- host-folded scalar params: [alpha/eps, bias] --------------------------
    scale = (jnp.asarray(alpha, jnp.float32) / jnp.float32(eps)).reshape(())
    bias32 = jnp.asarray(bias, jnp.float32).reshape(())
    params = jnp.stack([scale, bias32])     # (2,) f32, SMEM-resident

    data_spec = pl.BlockSpec((tr, width), lambda i: (i, 0))
    smem_spec = pl.BlockSpec(memory_space=pltpu.MemorySpace.SMEM)
    cparams = pltpu.CompilerParams(dimension_semantics=("parallel",))

    if g > 1:
        # Constant block-diagonal ones matrix for the MXU segmented reduce.
        idx = jnp.arange(width)
        blockdiag = (idx[:, None] // h == idx[None, :] // h).astype(jnp.float32)
        out2 = pl.pallas_call(
            functools.partial(_layernorm_kernel_packed, h=h),
            out_shape=jax.ShapeDtypeStruct((packed_rows, width), dtype),
            grid_spec=pltpu.PrefetchScalarGridSpec(
                num_scalar_prefetch=0,
                grid=grid,
                in_specs=[
                    smem_spec,                                      # params
                    pl.BlockSpec((width, width), lambda i: (0, 0)),  # block-diag (resident)
                    data_spec,                                      # x tile
                ],
                out_specs=data_spec,
            ),
            compiler_params=cparams,
        )(params, blockdiag, x2)
        out_rows = out2.reshape(packed_rows * g, h)
        if pad_rows:
            out_rows = out_rows[:rows]
        return out_rows.reshape(orig_shape)

    out2 = pl.pallas_call(
        functools.partial(_layernorm_kernel_plain, h=h, width=width),
        out_shape=jax.ShapeDtypeStruct((packed_rows, width), dtype),
        grid_spec=pltpu.PrefetchScalarGridSpec(
            num_scalar_prefetch=0,
            grid=grid,
            in_specs=[smem_spec, data_spec],
            out_specs=data_spec,
        ),
        compiler_params=cparams,
    )(params, x2)
    if pad_lanes:
        out2 = out2[:, :h]
    return out2.reshape(orig_shape)


def _reference(x, alpha, bias, *, eps=EPS):
    x32 = x.astype(jnp.float32)
    mean = jnp.mean(x32, axis=-1, keepdims=True)
    std = jnp.std(x32, axis=-1, keepdims=True, ddof=1)
    return (alpha * (x32 - mean) / (std * eps) + bias).astype(x.dtype)


if __name__ == "__main__":
    key = jax.random.PRNGKey(0)
    batch, seq, hidden = 2, 8, 32
    x = jax.random.normal(key, (batch, seq, hidden), dtype=jnp.float32)

    # nn.Parameter(torch.ones(1)) / nn.Parameter(torch.zeros(1))
    alpha = jnp.ones((1,), jnp.float32)
    bias = jnp.zeros((1,), jnp.float32)

    out = jax.block_until_ready(layer_normalization(x, alpha, bias))
    ref = _reference(x, alpha, bias)

    assert out.shape == x.shape
    # Outputs are ~1e6 in magnitude because the reference divides by std * eps;
    # compare with a magnitude-relative tolerance.
    denom = jnp.maximum(jnp.max(jnp.abs(ref)), 1.0)
    rel_err = jnp.max(jnp.abs(out - ref)) / denom
    assert rel_err < 1e-4, f"mismatch vs reference: rel_err={rel_err}"

    print("KERNEL_OK")
</pallas_src>

<mosaic_0001>
module attributes {stable_mosaic.version = 11 : i64} {
  func.func @_layernorm_kernel_packed(%arg0: i32, %arg1: memref<2xf32, #tpu.memory_space<smem>>, %arg2: memref<128x128xf32, #tpu.memory_space<vmem>>, %arg3: memref<4x128xf32, #tpu.memory_space<vmem>>, %arg4: memref<4x128xf32, #tpu.memory_space<vmem>>) attributes {dimension_semantics = [#tpu.dimension_semantics<parallel>], iteration_bounds = array<i64: 1>, scalar_prefetch = 0 : i64, scratch_operands = 0 : i64, tpu.core_type = #tpu.core_type<tc>, window_params = [{transform_indices = @transform_0, window_bounds = array<i64: 2>}, {pipeline_mode = #tpu.pipeline_mode<synchronous>, transform_indices = @transform_1, window_bounds = array<i64: 128, 128>}, {transform_indices = @transform_2, window_bounds = array<i64: 4, 128>}, {transform_indices = @transform_3, window_bounds = array<i64: 4, 128>}]} {
    %c0 = arith.constant 0 : index
    %c0_0 = arith.constant 0 : index
    %0 = vector.load %arg3[%c0, %c0_0] : memref<4x128xf32, #tpu.memory_space<vmem>>, vector<4x128xf32>
    %c0_1 = arith.constant 0 : index
    %c0_2 = arith.constant 0 : index
    %1 = vector.load %arg2[%c0_1, %c0_2] : memref<128x128xf32, #tpu.memory_space<vmem>>, vector<128x128xf32>
    %cst = arith.constant dense<0.000000e+00> : vector<4x128xf32>
    %2 = tpu.matmul %0, %1, %cst {dimension_numbers = #tpu.dot_dimension_numbers<[1], [0], [0], [1], [0, 0, 1, 1], [], []>, precision = #tpu.contract_precision<fp32>} : vector<4x128xf32>, vector<128x128xf32>, vector<4x128xf32> -> vector<4x128xf32>
    %cst_3 = arith.constant 3.125000e-02 : f32
    %3 = vector.broadcast %cst_3 : f32 to vector<4x128xf32>
    %4 = arith.mulf %2, %3 : vector<4x128xf32>
    %5 = arith.subf %0, %4 : vector<4x128xf32>
    %6 = arith.mulf %5, %5 : vector<4x128xf32>
    %cst_4 = arith.constant dense<0.000000e+00> : vector<4x128xf32>
    %7 = tpu.matmul %6, %1, %cst_4 {dimension_numbers = #tpu.dot_dimension_numbers<[1], [0], [0], [1], [0, 0, 1, 1], [], []>, precision = #tpu.contract_precision<fp32>} : vector<4x128xf32>, vector<128x128xf32>, vector<4x128xf32> -> vector<4x128xf32>
    %cst_5 = arith.constant 0.0322580636 : f32
    %8 = vector.broadcast %cst_5 : f32 to vector<4x128xf32>
    %9 = arith.mulf %7, %8 : vector<4x128xf32>
    %10 = math.rsqrt %9 : vector<4x128xf32>
    %c0_6 = arith.constant 0 : index
    %11 = memref.load %arg1[%c0_6] : memref<2xf32, #tpu.memory_space<smem>>
    %c1 = arith.constant 1 : index
    %12 = memref.load %arg1[%c1] : memref<2xf32, #tpu.memory_space<smem>>
    %13 = vector.broadcast %11 : f32 to vector<4x128xf32>
    %14 = arith.mulf %10, %13 : vector<4x128xf32>
    %15 = arith.mulf %5, %14 : vector<4x128xf32>
    %16 = vector.broadcast %12 : f32 to vector<4x128xf32>
    %17 = arith.addf %15, %16 : vector<4x128xf32>
    %c0_7 = arith.constant 0 : index
    %c0_8 = arith.constant 0 : index
    %18 = vector.load %arg4[%c0_7, %c0_8] : memref<4x128xf32, #tpu.memory_space<vmem>>, vector<4x128xf32>
    tpu.vector_store %arg4[%c0_7, %c0_8], %17 {strides = array<i32>} : memref<4x128xf32, #tpu.memory_space<vmem>>, vector<4x128xf32>,
    return
  }
  func.func @transform_0(%arg0: i32) -> i32 {
    %c0_i32 = arith.constant 0 : i32
    %c0_i32_0 = arith.constant 0 : i32
    return %c0_i32 : i32
  }
  func.func @transform_1(%arg0: i32) -> (i32, i32) {
    %c0_i32 = arith.constant 0 : i32
    %c0_i32_0 = arith.constant 0 : i32
    %c0_i32_1 = arith.constant 0 : i32
    return %c0_i32, %c0_i32_0 : i32, i32
  }
  func.func @transform_2(%arg0: i32) -> (i32, i32) {
    %c0_i32 = arith.constant 0 : i32
    %c0_i32_0 = arith.constant 0 : i32
    return %arg0, %c0_i32 : i32, i32
  }
  func.func @transform_3(%arg0: i32) -> (i32, i32) {
    %c0_i32 = arith.constant 0 : i32
    %c0_i32_0 = arith.constant 0 : i32
    return %arg0, %c0_i32 : i32, i32
  }
}

</mosaic_0001>

<bundles_post_ra>
// kernel: tpu_custom_call.1
= control target key start
LH: loop header
LB: loop body
LE: loop exit
PB: predicated region body
PF: predicated region fallthrough
CT: control target
= control target key end

     0   :  { %8 = vsyncpa [#allocation5], 0  ;;  %s2829_s0 = inlined_call_operand.hbm [shape: f32[2], index: 0, kind: input, shape index: {}]   ;;  %s2830_s1 = inlined_call_operand.hbm [shape: f32[128,128], index: 1, kind: input, shape index: {}]   ;;  %s2831_s2 = inlined_call_operand.vmem [shape: f32[4,128], index: 2, kind: input, shape index: {}]   ;;  %s2832_s3 = inlined_call_operand.hbm [shape: f32[4,128], index: 3, kind: output, shape index: {}]  }
   0x1   :  { %9 = vsyncpa [#allocation3], 0 }
   0x2   :  { %10 = vsyncpa [#allocation4], 0  ;;  %s2311_s14 = scalar_lea.hbm %s2829_s0, 16 }
   0x3   :  { %p2312_p0 = scmp.ne.s32.totalorder %s2829_s0, %s2311_s14  ;;  %p2315_p1 = scmp.lt.u32.totalorder %s2311_s14, %s2829_s0 }
   0x5   :  { %p2317_p2 = pnand %p2315_p1, %p2312_p0 }
   0x7   :  { %2320 = shalt.err (!%p2317_p2)
}
   0x8   :  { %s2371_s19 = smov [#allocation2]   ;;  %s2372_s22 = smov [#allocation6]  }
   0x9   :  { %18 = dma.hbm_to_smem %s2829_s0, 16, %s2371_s19, [#allocation5]  }
   0xa   :  { %s24_s23 = sshll.u32 %s2372_s22, 4  ;;  %s2321_s26 = scalar_lea.hbm %s2830_s1, 2048  ;;  %s25_s23 = int_to_ptr.vmem [resolvable:$true] %s24_s23 }
   0xb   :  { %p2322_p3 = scmp.ne.s32.totalorder %s2830_s1, %s2321_s26  ;;  %p2325_p4 = scmp.lt.u32.totalorder %s2321_s26, %s2830_s1 }
   0xd   :  { %p2327_p5 = pnand %p2325_p4, %p2322_p3 }
   0xf   :  { %2330 = shalt.err (!%p2327_p5)
}
  0x10   :  { %s2331_s4 = scalar_lea.vmem %s25_s23, 2048  ;;  %p2336_p7 = scmp.lt.s32.totalorder %s25_s23, %s25_s23 }
  0x11   :  { %p2332_p6 = scmp.ne.s32.totalorder %s25_s23, %s2331_s4  ;;  %p2337_p8 = scmp.lt.s32.totalorder %s2331_s4, %s2331_s4 }
  0x13   :  { %p2338_p9 = por %p2337_p8, %p2336_p7 }
  0x15   :  { %p2339_p10 = pnand %p2338_p9, %p2332_p6 }
  0x17   :  { %2342 = shalt.err (!%p2339_p10)
}
  0x18   :  { %s2373_s0 = smov 128   ;;  %s2374_s5 = smov 8  }
  0x19   :  { %30 = dma.hbm_to_vmem [thread:$0]  %s2830_s1, 2048, %s25_s23, [#allocation3], %s2373_s0, %s2373_s0, %s2374_s5  }
  0x1a   :  { %2365 = dma.done.wait [#allocation5], 16  }
  0x1b   :  { %2366 = vsyncadd [#allocation5], 4294967280 }
  0x1c   :  { %2367 = dma.done.wait [#allocation3], 2048  }
  0x1d   :  { %2368 = vsyncadd [#allocation3], 4294965248 }
  0x1e   :  { %39 = sfence }
  0x1f   :  { %v41_v0 = vld [vmem:[#allocation6] sm:$0xff]  ;;  %v42_v1 = vld [vmem:[#allocation6 + $0x8] sm:$0xff]  ;;  %v43_v2 = vld [vmem:[#allocation6 + $0x10] sm:$0xff]  ;;  %v2375_v3 = vmov 0.0|0.0   ;;  %vm2376_vm0 = vmmov 0   ;;  %v2377_v8 = vmov 0.0  }
  0x20   :  { %1993 = vmatprep.subr.bf16.mxu0 %v2375_v3  ;;  %v58_v4 = vand.u32 4294901760, %v41_v0  ;;  %v61_v5 = vand.u32 4294901760, %v42_v1  ;;  %v44_v6 = vld [vmem:[#allocation6 + $0x18] sm:$0xff]  ;;  %v64_v7 = vand.u32 4294901760, %v43_v2  ;;  %1605 = vmatprep.mubr.msk.f32.mxu0 %vm2376_vm0, %v2377_v8  ;;  %v45_v10 = vld [vmem:[#allocation6 + $0x20] sm:$0xff]  ;;  %v46_v11 = vld [vmem:[#allocation6 + $0x28] sm:$0xff] }
  0x21   :  { %v67_v9 = vand.u32 4294901760, %v44_v6  ;;  %2137 = vmatprep.subr.bf16.mxu1 %v2375_v3  ;;  %1815 = vmatprep.mubr.msk.f32.mxu1 %vm2376_vm0, %v2377_v8  ;;  %v70_v14 = vand.u32 4294901760, %v45_v10  ;;  %v73_v15 = vand.u32 4294901760, %v46_v11  ;;  %v47_v16 = vld [vmem:[#allocation6 + $0x30] sm:$0xff]  ;;  %v48_v17 = vld [vmem:[#allocation6 + $0x38] sm:$0xff]  ;;  %v49_v21 = vld [vmem:[#allocation6 + $0x40] sm:$0xff] }
  0x22   :  { %v2429_v12 = vpack.c.bf16 %v61_v5, %v58_v4  ;;  %v76_v19 = vand.u32 4294901760, %v47_v16  ;;  %v79_v20 = vand.u32 4294901760, %v48_v17  ;;  %v2443_v22 = vld [vmem:[%s2831_s2] sm:$0xf]  ;;  %v50_v23 = vld [vmem:[#allocation6 + $0x48] sm:$0xff]  ;;  %v51_v24 = vld [vmem:[#allocation6 + $0x50] sm:$0xff]  ;;  %v2454_v34 = vsub.f32 %v41_v0, %v58_v4 }
  0x23   :  { %v2432_v13 = vpack.c.bf16 %v67_v9, %v64_v7  ;;  %v2438_v18 = vpack.c.bf16 %v73_v15, %v70_v14  ;;  %v52_v25 = vld [vmem:[#allocation6 + $0x58] sm:$0xff]  ;;  %v53_v26 = vld [vmem:[#allocation6 + $0x60] sm:$0xff]  ;;  %v82_v27 = vand.u32 4294901760, %v49_v21  ;;  %v54_v28 = vld [vmem:[#allocation6 + $0x68] sm:$0xff]  ;;  %v2449_v31 = vand.u32 4294901760, %v2443_v22  ;;  %s1344_s2 = sld [smem:[#allocation2]] }
  0x24   :  { %1995 = vmatpush3.bf16.msra.mxu0 %v2429_v12  ;;  %2139 = vmatpush3.bf16.msra.mxu1 %v2429_v12  ;;  %v55_v29 = vld [vmem:[#allocation6 + $0x70] sm:$0xff]  ;;  %v56_v30 = vld [vmem:[#allocation6 + $0x78] sm:$0xff]  ;;  %v2452_v32 = vpack.c.bf16 %v79_v20, %v76_v19  ;;  %v85_v33 = vand.u32 4294901760, %v50_v23  ;;  %v2456_v35 = vsub.f32 %v42_v1, %v61_v5  ;;  %v88_v36 = vand.u32 4294901760, %v51_v24  ;;  %s1368_s9 = sld [smem:[#allocation2 + $0x1]]  ;;  %s2378_s10 = smov [#allocation7]  }
  0x25   :  { %1996 = vmatprep.subr.bf16.mxu0 %v2375_v3  ;;  %2140 = vmatprep.subr.bf16.mxu1 %v2375_v3  ;;  %v91_v37 = vand.u32 4294901760, %v52_v25  ;;  %v94_v38 = vand.u32 4294901760, %v53_v26  ;;  %v97_v39 = vand.u32 4294901760, %v54_v28  ;;  %v100_v40 = vand.u32 4294901760, %v55_v29  ;;  %s1358_s11 = sshll.u32 %s2378_s10, 4  ;;  %s1359_s11 = int_to_ptr.vmem [resolvable:$true] %s1358_s11 }
  0x26   :  { %v103_v41 = vand.u32 4294901760, %v56_v30  ;;  %v2463_v42 = vsub.f32 %v2443_v22, %v2449_v31  ;;  %v2465_v43 = vsub.f32 %v43_v2, %v64_v7  ;;  %v2468_v44 = vpack.c.bf16 %v85_v33, %v82_v27  ;;  %s2343_s12 = scalar_lea.vmem %s1359_s11, 64  ;;  %p2348_p12 = scmp.lt.s32.totalorder %s1359_s11, %s1359_s11 }
  0x27   :  { %v151_v45 = vand.u32 4294901760, %v2454_v34  ;;  %v158_v46 = vand.u32 4294901760, %v2456_v35  ;;  %v2472_v47 = vsub.f32 %v44_v6, %v67_v9  ;;  %v2476_v48 = vsub.f32 %v45_v10, %v70_v14  ;;  %p2344_p11 = scmp.ne.s32.totalorder %s1359_s11, %s2343_s12  ;;  %p2349_p13 = scmp.lt.s32.totalorder %s2343_s12, %s2343_s12 }
  0x28   :  { %1998 = vmatpush3.bf16.msra.mxu0 %v2432_v13  ;;  %2142 = vmatpush3.bf16.msra.mxu1 %v2432_v13  ;;  %v2479_v49 = vpack.c.bf16 %v91_v37, %v88_v36  ;;  %v2481_v50 = vpack.c.bf16 %v97_v39, %v94_v38  ;;  %v2483_v51 = vpack.c.bf16 %v103_v41, %v100_v40  ;;  %v140_v52 = vand.u32 4294901760, %v2463_v42 }
  0x29   :  { %1999 = vmatprep.subr.bf16.mxu0 %v2375_v3  ;;  %2143 = vmatprep.subr.bf16.mxu1 %v2375_v3  ;;  %v165_v53 = vand.u32 4294901760, %v2465_v43  ;;  %v2487_v54 = vsub.f32 %v46_v11, %v73_v15  ;;  %v2489_v55 = vsub.f32 %v47_v16, %v76_v19  ;;  %v152_v56 = vsub.f32 %v2454_v34, %v151_v45  ;;  %p2350_p0 = por %p2349_p13, %p2348_p12 }
  0x2a   :  { %v159_v57 = vsub.f32 %v2456_v35, %v158_v46  ;;  %v172_v58 = vand.u32 4294901760, %v2472_v47  ;;  %v2495_v59 = vsub.f32 %v48_v17, %v79_v20  ;;  %v179_v60 = vand.u32 4294901760, %v2476_v48 }
  0x2b   :  { %v2500_v61 = vsub.f32 %v49_v21, %v82_v27  ;;  %v2502_v62 = vsub.f32 %v50_v23, %v85_v33  ;;  %v2504_v63 = vsub.f32 %v51_v24, %v88_v36  ;;  %v2507_v0 = vsub.f32 %v52_v25, %v91_v37  ;;  %p2351_p1 = pnand %p2350_p0, %p2344_p11 }
  0x2c   :  { %2001 = vmatpush3.bf16.msra.mxu0 %v2438_v18  ;;  %2145 = vmatpush3.bf16.msra.mxu1 %v2438_v18  ;;  %v2509_v1 = vsub.f32 %v53_v26, %v94_v38  ;;  %v2511_v2 = vsub.f32 %v54_v28, %v97_v39  ;;  %v2513_v4 = vsub.f32 %v55_v29, %v100_v40  ;;  %v186_v7 = vand.u32 4294901760, %v2487_v54 }
  0x2d   :  { %2002 = vmatprep.subr.bf16.mxu0 %v2375_v3  ;;  %2146 = vmatprep.subr.bf16.mxu1 %v2375_v3  ;;  %v141_v5 = vsub.f32 %v2463_v42, %v140_v52  ;;  %v166_v6 = vsub.f32 %v2465_v43, %v165_v53  ;;  %v2520_v9 = vsub.f32 %v56_v30, %v103_v41  ;;  %v153_v10 = vand.u32 4294901760, %v152_v56 }
  0x2e   :  { %v160_v11 = vand.u32 4294901760, %v159_v57  ;;  %v173_v14 = vsub.f32 %v2472_v47, %v172_v58  ;;  %v193_v15 = vand.u32 4294901760, %v2489_v55  ;;  %v200_v16 = vand.u32 4294901760, %v2495_v59 }
  0x2f   :  { %v207_v17 = vand.u32 4294901760, %v2500_v61  ;;  %v214_v19 = vand.u32 4294901760, %v2502_v62  ;;  %v221_v20 = vand.u32 4294901760, %v2504_v63  ;;  %v228_v21 = vand.u32 4294901760, %v2507_v0 }
  0x30   :  { %2004 = vmatpush3.bf16.msra.mxu0 %v2452_v32  ;;  %2148 = vmatpush3.bf16.msra.mxu1 %v2452_v32  ;;  %v235_v23 = vand.u32 4294901760, %v2509_v1  ;;  %v242_v24 = vand.u32 4294901760, %v2511_v2  ;;  %v249_v25 = vand.u32 4294901760, %v2513_v4  ;;  %v256_v26 = vand.u32 4294901760, %v2520_v9 }
  0x31   :  { %2005 = vmatprep.subr.bf16.mxu0 %v2375_v3  ;;  %2149 = vmatprep.subr.bf16.mxu1 %v2375_v3  ;;  %v2537_v27 = vpack.c.bf16 %v158_v46, %v151_v45  ;;  %v2539_v28 = vpack.c.bf16 %v172_v58, %v165_v53  ;;  %v2541_v29 = vpack.c.bf16 %v186_v7, %v179_v60  ;;  %v142_v39 = vand.u32 4294901760, %v141_v5 }
  0x32   :  { %v2544_v30 = vpack.c.bf16 %v200_v16, %v193_v15  ;;  %v2546_v33 = vpack.c.bf16 %v214_v19, %v207_v17  ;;  %v2548_v36 = vpack.c.bf16 %v228_v21, %v221_v20  ;;  %v2550_v37 = vpack.c.bf16 %v242_v24, %v235_v23 }
  0x33   :  { %v2553_v38 = vpack.c.bf16 %v256_v26, %v249_v25  ;;  %v180_v40 = vsub.f32 %v2476_v48, %v179_v60  ;;  %v2559_v41 = vpack.c.bf16 %v160_v11, %v153_v10  ;;  %v167_v45 = vand.u32 4294901760, %v166_v6 }
  0x34   :  { %2007 = vmatpush3.bf16.msra.mxu0 %v2468_v44  ;;  %2151 = vmatpush3.bf16.msra.mxu1 %v2468_v44  ;;  %v174_v46 = vand.u32 4294901760, %v173_v14  ;;  %v187_v53 = vsub.f32 %v2487_v54, %v186_v7  ;;  %v194_v56 = vsub.f32 %v2489_v55, %v193_v15  ;;  %v201_v5 = vsub.f32 %v2495_v59, %v200_v16 }
  0x35   :  { %2008 = vmatprep.subr.bf16.mxu0 %v2375_v3  ;;  %2152 = vmatprep.subr.bf16.mxu1 %v2375_v3  ;;  %v181_v58 = vand.u32 4294901760, %v180_v40  ;;  %v208_v11 = vsub.f32 %v2500_v61, %v207_v17  ;;  %v215_v14 = vsub.f32 %v2502_v62, %v214_v19  ;;  %v222_v15 = vsub.f32 %v2504_v63, %v221_v20 }
  0x36   :  { %v2567_v57 = vpack.c.bf16 %v174_v46, %v167_v45  ;;  %v188_v60 = vand.u32 4294901760, %v187_v53  ;;  %v195_v6 = vand.u32 4294901760, %v194_v56  ;;  %v202_v10 = vand.u32 4294901760, %v201_v5 }
  0x37   :  { %v216_v40 = vand.u32 4294901760, %v215_v14  ;;  %v229_v45 = vsub.f32 %v2507_v0, %v228_v21  ;;  %v236_v46 = vsub.f32 %v2509_v1, %v235_v23  ;;  %v223_v19 = vand.u32 4294901760, %v222_v15 }
  0x38   :  { %2010 = vmatpush3.bf16.msra.mxu0 %v2479_v49  ;;  %2154 = vmatpush3.bf16.msra.mxu1 %v2479_v49  ;;  %v2574_v7 = vpack.c.bf16 %v188_v60, %v181_v58  ;;  %v2581_v16 = vpack.c.bf16 %v202_v10, %v195_v6  ;;  %v243_v20 = vsub.f32 %v2511_v2, %v242_v24 }
  0x39   :  { %2011 = vmatprep.subr.bf16.mxu0 %v2375_v3  ;;  %2155 = vmatprep.subr.bf16.mxu1 %v2375_v3  ;;  %v230_v53 = vand.u32 4294901760, %v229_v45  ;;  %v250_v56 = vsub.f32 %v2513_v4, %v249_v25  ;;  %v237_v21 = vand.u32 4294901760, %v236_v46  ;;  %v257_v23 = vsub.f32 %v2520_v9, %v256_v26 }
  0x3a   :  { %v244_v60 = vand.u32 4294901760, %v243_v20  ;;  %v2608_v26 = vpack.c.bf16 %v2456_v35, %v2454_v34  ;;  %v2615_v10 = vpack.c.bf16 %v2472_v47, %v2465_v43  ;;  %v2623_v34 = vpack.c.bf16 %v2487_v54, %v2476_v48 }
  0x3b   :  { %v2593_v58 = vpack.c.bf16 %v230_v53, %v223_v19  ;;  %v251_v6 = vand.u32 4294901760, %v250_v56  ;;  %v258_v24 = vand.u32 4294901760, %v257_v23  ;;  %v2629_v35 = vpack.c.bf16 %v2495_v59, %v2489_v55 }
  0x3c   :  { %2013 = vmatpush3.bf16.msra.mxu0 %v2481_v50  ;;  %2157 = vmatpush3.bf16.msra.mxu1 %v2481_v50  ;;  %v2598_v5 = vpack.c.bf16 %v244_v60, %v237_v21  ;;  %v2635_v43 = vpack.c.bf16 %v2502_v62, %v2500_v61  ;;  %v2641_v47 = vpack.c.bf16 %v2507_v0, %v2504_v63 }
  0x3d   :  { %2014 = vmatprep.subr.bf16.mxu0 %v2375_v3  ;;  %2158 = vmatprep.subr.bf16.mxu1 %v2375_v3  ;;  %v2602_v25 = vpack.c.bf16 %v258_v24, %v251_v6  ;;  %v2647_v48 = vpack.c.bf16 %v2511_v2, %v2509_v1  ;;  %v2653_v54 = vpack.c.bf16 %v2520_v9, %v2513_v4 }
  0x40   :  { %2016 = vmatpush3.bf16.msra.mxu0 %v2483_v51  ;;  %2160 = vmatpush3.bf16.msra.mxu1 %v2483_v51 }
  0x41   :  { %2017 = vmatprep.subr.bf16.mxu0 %v2375_v3  ;;  %2161 = vmatprep.subr.bf16.mxu1 %v2375_v3 }
  0x43   :  { %1606 = vmatmul.mubr.f32.vlgmr.msra.gmra.mrb[0].mxu0 %v142_v39  ;;  %v209_v39 = vand.u32 4294901760, %v208_v11 }
  0x44   :  { %2019 = vmatpush3.bf16.msra.mxu0 %v2559_v41  ;;  %1640 = vmatprep.mubr.msk.f32.mxu0 %vm2376_vm0, %v2377_v8 }
  0x45   :  { %2020 = vmatprep.subr.bf16.mxu0 %v2375_v3  ;;  %v2587_v17 = vpack.c.bf16 %v216_v40, %v209_v39 }
  0x48   :  { %2022 = vmatpush3.bf16.msra.mxu0 %v2567_v57 }
  0x49   :  { %2023 = vmatprep.subr.bf16.mxu0 %v2375_v3 }
  0x4c   :  { %2025 = vmatpush3.bf16.msra.mxu0 %v2574_v7 }
  0x4d   :  { %2026 = vmatprep.subr.bf16.mxu0 %v2375_v3 }
  0x50   :  { %2028 = vmatpush3.bf16.msra.mxu0 %v2581_v16 }
  0x51   :  { %2029 = vmatprep.subr.bf16.mxu0 %v2375_v3 }
  0x54   :  { %2031 = vmatpush3.bf16.msra.mxu0 %v2587_v17 }
  0x55   :  { %2032 = vmatprep.subr.bf16.mxu0 %v2375_v3 }
  0x58   :  { %2034 = vmatpush3.bf16.msra.mxu0 %v2593_v58 }
  0x59   :  { %2035 = vmatprep.subr.bf16.mxu0 %v2375_v3 }
  0x5c   :  { %2037 = vmatpush3.bf16.msra.mxu0 %v2598_v5 }
  0x5d   :  { %2038 = vmatprep.subr.bf16.mxu0 %v2375_v3 }
  0x60   :  { %2040 = vmatpush3.bf16.msra.mxu0 %v2602_v25 }
  0x61   :  { %2041 = vmatprep.subr.bf16.mxu0 %v2375_v3 }
  0x63   :  { %1641 = vmatmul.mubr.f32.vlgmr.msra.gmra.mrb[0].mxu0 %v2449_v31 }
  0x64   :  { %2043 = vmatpush3.bf16.msra.mxu0 %v2608_v26  ;;  %1675 = vmatprep.mubr.msk.f32.mxu0 %vm2376_vm0, %v2377_v8 }
  0x65   :  { %2044 = vmatprep.subr.bf16.mxu0 %v2375_v3 }
  0x68   :  { %2046 = vmatpush3.bf16.msra.mxu0 %v2615_v10 }
  0x69   :  { %2047 = vmatprep.subr.bf16.mxu0 %v2375_v3 }
  0x6c   :  { %2049 = vmatpush3.bf16.msra.mxu0 %v2623_v34 }
  0x6d   :  { %2050 = vmatprep.subr.bf16.mxu0 %v2375_v3 }
  0x70   :  { %2052 = vmatpush3.bf16.msra.mxu0 %v2629_v35 }
  0x71   :  { %2053 = vmatprep.subr.bf16.mxu0 %v2375_v3 }
  0x74   :  { %2055 = vmatpush3.bf16.msra.mxu0 %v2635_v43 }
  0x75   :  { %2056 = vmatprep.subr.bf16.mxu0 %v2375_v3 }
  0x78   :  { %2058 = vmatpush3.bf16.msra.mxu0 %v2641_v47 }
  0x79   :  { %2059 = vmatprep.subr.bf16.mxu0 %v2375_v3 }
  0x7c   :  { %2061 = vmatpush3.bf16.msra.mxu0 %v2647_v48 }
  0x7d   :  { %2062 = vmatprep.subr.bf16.mxu0 %v2375_v3 }
  0x80   :  { %2064 = vmatpush3.bf16.msra.mxu0 %v2653_v54 }
  0x81   :  { %2065 = vmatprep.subr.bf16.mxu0 %v2375_v3 }
  0x83   :  { %1676 = vmatmul.mubr.f32.vlgmr.msra.gmra.mrb[0].mxu0 %v2463_v42 }
  0x84   :  { %2067 = vmatpush3.bf16.msra.mxu0 %v2429_v12  ;;  %1710 = vmatprep.mubr.msk.f32.mxu0 %vm2376_vm0, %v2377_v8 }
  0x85   :  { %2068 = vmatprep.subr.bf16.mxu0 %v2375_v3 }
  0x88   :  { %2070 = vmatpush3.bf16.msra.mxu0 %v2432_v13 }
  0x89   :  { %2071 = vmatprep.subr.bf16.mxu0 %v2375_v3 }
  0x8c   :  { %2073 = vmatpush3.bf16.msra.mxu0 %v2438_v18 }
  0x8d   :  { %2074 = vmatprep.subr.bf16.mxu0 %v2375_v3 }
  0x90   :  { %2076 = vmatpush3.bf16.msra.mxu0 %v2452_v32 }
  0x91   :  { %2077 = vmatprep.subr.bf16.mxu0 %v2375_v3 }
  0x94   :  { %2079 = vmatpush3.bf16.msra.mxu0 %v2468_v44 }
  0x95   :  { %2080 = vmatprep.subr.bf16.mxu0 %v2375_v3 }
  0x98   :  { %2082 = vmatpush3.bf16.msra.mxu0 %v2479_v49 }
  0x99   :  { %2083 = vmatprep.subr.bf16.mxu0 %v2375_v3 }
  0x9c   :  { %2085 = vmatpush3.bf16.msra.mxu0 %v2481_v50 }
  0x9d   :  { %2086 = vmatprep.subr.bf16.mxu0 %v2375_v3 }
  0xa0   :  { %2088 = vmatpush3.bf16.msra.mxu0 %v2483_v51 }
  0xa1   :  { %2089 = vmatprep.subr.bf16.mxu0 %v2375_v3 }
  0xa3   :  { %1711 = vmatmul.mubr.f32.vlgmr.msra.gmra.mrb[0].mxu0 %v140_v52 }
  0xa4   :  { %2091 = vmatpush3.bf16.msra.mxu0 %v2537_v27  ;;  %1745 = vmatprep.mubr.msk.f32.mxu0 %vm2376_vm0, %v2377_v8 }
  0xa5   :  { %2092 = vmatprep.subr.bf16.mxu0 %v2375_v3 }
  0xa8   :  { %2094 = vmatpush3.bf16.msra.mxu0 %v2539_v28 }
  0xa9   :  { %2095 = vmatprep.subr.bf16.mxu0 %v2375_v3 }
  0xac   :  { %2097 = vmatpush3.bf16.msra.mxu0 %v2541_v29 }
  0xad   :  { %2098 = vmatprep.subr.bf16.mxu0 %v2375_v3 }
  0xb0   :  { %2100 = vmatpush3.bf16.msra.mxu0 %v2544_v30 }
  0xb1   :  { %2101 = vmatprep.subr.bf16.mxu0 %v2375_v3 }
  0xb4   :  { %2103 = vmatpush3.bf16.msra.mxu0 %v2546_v33 }
  0xb5   :  { %2104 = vmatprep.subr.bf16.mxu0 %v2375_v3 }
  0xb8   :  { %2106 = vmatpush3.bf16.msra.mxu0 %v2548_v36 }
  0xb9   :  { %2107 = vmatprep.subr.bf16.mxu0 %v2375_v3 }
  0xbc   :  { %2109 = vmatpush3.bf16.msra.mxu0 %v2550_v37 }
  0xbd   :  { %2110 = vmatprep.subr.bf16.mxu0 %v2375_v3 }
  0xc0   :  { %2112 = vmatpush3.bf16.msra.mxu0 %v2553_v38 }
  0xc1   :  { %2113 = vmatprep.subr.bf16.mxu0 %v2375_v3 }
  0xc3   :  { %1746 = vmatmul.mubr.f32.vlgmr.msra.gmra.mrb[0].mxu0 %v2449_v31 }
  0xc4   :  { %2115 = vmatpush3.bf16.msra.mxu0 %v2429_v12  ;;  %1780 = vmatprep.mubr.msk.f32.mxu0 %vm2376_vm0, %v2377_v8 }
  0xc5   :  { %2116 = vmatprep.subr.bf16.mxu0 %v2375_v3 }
  0xc8   :  { %2118 = vmatpush3.bf16.msra.mxu0 %v2432_v13 }
  0xc9   :  { %2119 = vmatprep.subr.bf16.mxu0 %v2375_v3 }
  0xcc   :  { %2121 = vmatpush3.bf16.msra.mxu0 %v2438_v18 }
  0xcd   :  { %2122 = vmatprep.subr.bf16.mxu0 %v2375_v3 }
  0xd0   :  { %2124 = vmatpush3.bf16.msra.mxu0 %v2452_v32 }
  0xd1   :  { %2125 = vmatprep.subr.bf16.mxu0 %v2375_v3 }
  0xd4   :  { %2127 = vmatpush3.bf16.msra.mxu0 %v2468_v44 }
  0xd5   :  { %2128 = vmatprep.subr.bf16.mxu0 %v2375_v3 }
  0xd8   :  { %2130 = vmatpush3.bf16.msra.mxu0 %v2479_v49 }
  0xd9   :  { %2131 = vmatprep.subr.bf16.mxu0 %v2375_v3 }
  0xdc   :  { %2133 = vmatpush3.bf16.msra.mxu0 %v2481_v50 }
  0xdd   :  { %2134 = vmatprep.subr.bf16.mxu0 %v2375_v3 }
  0xe0   :  { %2136 = vmatpush3.bf16.msra.mxu0 %v2483_v51 }
  0xe3   :  { %1781 = vmatmul.mubr.f32.vlgmr.msra.gmra.mrb[0].mxu0 %v2449_v31 }
 0x1b6   :  { %v694_v42 = vpop.f32.mrb[0].mxu0 }
 0x1b7   :  { %v698_v52 = vmul.f32 0.03125, %v694_v42  ;;  %v1782_v55 = vpop.f32.mrb[1].mxu0 }
 0x1b9   :  { %v2717_v59 = vsub.f32 %v2443_v22, %v698_v52 }
 0x1bb   :  { %v700_v61 = vmul.f32 %v2717_v59, %v2717_v59 }
 0x1bd   :  { %v2721_v62 = vand.u32 4294901760, %v700_v61 }
 0x1bf   :  { %v783_v63 = vsub.f32 %v700_v61, %v2721_v62 }
 0x1c1   :  { %v784_v0 = vand.u32 4294901760, %v783_v63 }
 0x1c3   :  { %v785_v1 = vsub.f32 %v783_v63, %v784_v0 }
 0x1c5   :  { %v786_v2 = vand.u32 4294901760, %v785_v1 }
 0x1c7   :  { %1816 = vmatmul.mubr.f32.vlgmr.msra.gmra.mrb[0].mxu1 %v786_v2 }
 0x1c8   :  { %2163 = vmatpush3.bf16.msra.mxu1 %v2559_v41  ;;  %1850 = vmatprep.mubr.msk.f32.mxu1 %vm2376_vm0, %v2377_v8 }
 0x1c9   :  { %2164 = vmatprep.subr.bf16.mxu1 %v2375_v3 }
 0x1cc   :  { %2166 = vmatpush3.bf16.msra.mxu1 %v2567_v57 }
 0x1cd   :  { %2167 = vmatprep.subr.bf16.mxu1 %v2375_v3 }
 0x1d0   :  { %2169 = vmatpush3.bf16.msra.mxu1 %v2574_v7 }
 0x1d1   :  { %2170 = vmatprep.subr.bf16.mxu1 %v2375_v3 }
 0x1d4   :  { %2172 = vmatpush3.bf16.msra.mxu1 %v2581_v16 }
 0x1d5   :  { %2173 = vmatprep.subr.bf16.mxu1 %v2375_v3 }
 0x1d8   :  { %2175 = vmatpush3.bf16.msra.mxu1 %v2587_v17 }
 0x1d9   :  { %2176 = vmatprep.subr.bf16.mxu1 %v2375_v3 }
 0x1dc   :  { %2178 = vmatpush3.bf16.msra.mxu1 %v2593_v58 }
 0x1dd   :  { %2179 = vmatprep.subr.bf16.mxu1 %v2375_v3 }
 0x1e0   :  { %2181 = vmatpush3.bf16.msra.mxu1 %v2598_v5 }
 0x1e1   :  { %2182 = vmatprep.subr.bf16.mxu1 %v2375_v3 }
 0x1e4   :  { %2184 = vmatpush3.bf16.msra.mxu1 %v2602_v25 }
 0x1e5   :  { %2185 = vmatprep.subr.bf16.mxu1 %v2375_v3 }
 0x1e7   :  { %1851 = vmatmul.mubr.f32.vlgmr.msra.gmra.mrb[0].mxu1 %v2721_v62 }
 0x1e8   :  { %2187 = vmatpush3.bf16.msra.mxu1 %v2608_v26  ;;  %1885 = vmatprep.mubr.msk.f32.mxu1 %vm2376_vm0, %v2377_v8 }
 0x1e9   :  { %2188 = vmatprep.subr.bf16.mxu1 %v2375_v3 }
 0x1ec   :  { %2190 = vmatpush3.bf16.msra.mxu1 %v2615_v10 }
 0x1ed   :  { %2191 = vmatprep.subr.bf16.mxu1 %v2375_v3 }
 0x1f0   :  { %2193 = vmatpush3.bf16.msra.mxu1 %v2623_v34 }
 0x1f1   :  { %2194 = vmatprep.subr.bf16.mxu1 %v2375_v3 }
 0x1f4   :  { %2196 = vmatpush3.bf16.msra.mxu1 %v2629_v35 }
 0x1f5   :  { %2197 = vmatprep.subr.bf16.mxu1 %v2375_v3 }
 0x1f8   :  { %2199 = vmatpush3.bf16.msra.mxu1 %v2635_v43 }
 0x1f9   :  { %2200 = vmatprep.subr.bf16.mxu1 %v2375_v3 }
 0x1fc   :  { %2202 = vmatpush3.bf16.msra.mxu1 %v2641_v47 }
 0x1fd   :  { %2203 = vmatprep.subr.bf16.mxu1 %v2375_v3 }
 0x200   :  { %2205 = vmatpush3.bf16.msra.mxu1 %v2647_v48 }
 0x201   :  { %2206 = vmatprep.subr.bf16.mxu1 %v2375_v3 }
 0x204   :  { %2208 = vmatpush3.bf16.msra.mxu1 %v2653_v54 }
 0x205   :  { %2209 = vmatprep.subr.bf16.mxu1 %v2375_v3 }
 0x207   :  { %1886 = vmatmul.mubr.f32.vlgmr.msra.gmra.mrb[0].mxu1 %v783_v63 }
 0x208   :  { %2211 = vmatpush3.bf16.msra.mxu1 %v2429_v12  ;;  %1920 = vmatprep.mubr.msk.f32.mxu1 %vm2376_vm0, %v2377_v8 }
 0x209   :  { %2212 = vmatprep.subr.bf16.mxu1 %v2375_v3 }
 0x20c   :  { %2214 = vmatpush3.bf16.msra.mxu1 %v2432_v13 }
 0x20d   :  { %2215 = vmatprep.subr.bf16.mxu1 %v2375_v3 }
 0x210   :  { %2217 = vmatpush3.bf16.msra.mxu1 %v2438_v18 }
 0x211   :  { %2218 = vmatprep.subr.bf16.mxu1 %v2375_v3 }
 0x214   :  { %2220 = vmatpush3.bf16.msra.mxu1 %v2452_v32 }
 0x215   :  { %2221 = vmatprep.subr.bf16.mxu1 %v2375_v3 }
 0x218   :  { %2223 = vmatpush3.bf16.msra.mxu1 %v2468_v44 }
 0x219   :  { %2224 = vmatprep.subr.bf16.mxu1 %v2375_v3 }
 0x21c   :  { %2226 = vmatpush3.bf16.msra.mxu1 %v2479_v49 }
 0x21d   :  { %2227 = vmatprep.subr.bf16.mxu1 %v2375_v3 }
 0x220   :  { %2229 = vmatpush3.bf16.msra.mxu1 %v2481_v50 }
 0x221   :  { %2230 = vmatprep.subr.bf16.mxu1 %v2375_v3 }
 0x224   :  { %2232 = vmatpush3.bf16.msra.mxu1 %v2483_v51 }
 0x225   :  { %2233 = vmatprep.subr.bf16.mxu1 %v2375_v3 }
 0x227   :  { %1921 = vmatmul.mubr.f32.vlgmr.msra.gmra.mrb[0].mxu1 %v784_v0 }
 0x228   :  { %2235 = vmatpush3.bf16.msra.mxu1 %v2537_v27  ;;  %1955 = vmatprep.mubr.msk.f32.mxu1 %vm2376_vm0, %v2377_v8 }
 0x229   :  { %2236 = vmatprep.subr.bf16.mxu1 %v2375_v3 }
 0x22c   :  { %2238 = vmatpush3.bf16.msra.mxu1 %v2539_v28 }
 0x22d   :  { %2239 = vmatprep.subr.bf16.mxu1 %v2375_v3 }
 0x230   :  { %2241 = vmatpush3.bf16.msra.mxu1 %v2541_v29 }
 0x231   :  { %2242 = vmatprep.subr.bf16.mxu1 %v2375_v3 }
 0x234   :  { %2244 = vmatpush3.bf16.msra.mxu1 %v2544_v30 }
 0x235   :  { %2245 = vmatprep.subr.bf16.mxu1 %v2375_v3 }
 0x238   :  { %2247 = vmatpush3.bf16.msra.mxu1 %v2546_v33 }
 0x239   :  { %2248 = vmatprep.subr.bf16.mxu1 %v2375_v3 }
 0x23c   :  { %2250 = vmatpush3.bf16.msra.mxu1 %v2548_v36 }
 0x23d   :  { %2251 = vmatprep.subr.bf16.mxu1 %v2375_v3 }
 0x240   :  { %2253 = vmatpush3.bf16.msra.mxu1 %v2550_v37 }
 0x241   :  { %2254 = vmatprep.subr.bf16.mxu1 %v2375_v3 }
 0x244   :  { %2256 = vmatpush3.bf16.msra.mxu1 %v2553_v38 }
 0x245   :  { %2257 = vmatprep.subr.bf16.mxu1 %v2375_v3 }
 0x247   :  { %1956 = vmatmul.mubr.f32.vlgmr.msra.gmra.mrb[0].mxu1 %v2721_v62 }
 0x248   :  { %2259 = vmatpush3.bf16.msra.mxu1 %v2429_v12  ;;  %1990 = vmatprep.mubr.msk.f32.mxu1 %vm2376_vm0, %v2377_v8 }
 0x249   :  { %2260 = vmatprep.subr.bf16.mxu1 %v2375_v3 }
 0x24c   :  { %2262 = vmatpush3.bf16.msra.mxu1 %v2432_v13 }
 0x24d   :  { %2263 = vmatprep.subr.bf16.mxu1 %v2375_v3 }
 0x250   :  { %2265 = vmatpush3.bf16.msra.mxu1 %v2438_v18  ;;  %v1346_v18 = vstv %s1344_s2 }
 0x251   :  { %2266 = vmatprep.subr.bf16.mxu1 %v2375_v3 }
 0x254   :  { %2268 = vmatpush3.bf16.msra.mxu1 %v2452_v32  ;;  %v1349_v32 = vstv %s1368_s9 }
 0x255   :  { %2269 = vmatprep.subr.bf16.mxu1 %v2375_v3 }
 0x258   :  { %2271 = vmatpush3.bf16.msra.mxu1 %v2468_v44 }
 0x259   :  { %2272 = vmatprep.subr.bf16.mxu1 %v2375_v3 }
 0x25c   :  { %2274 = vmatpush3.bf16.msra.mxu1 %v2479_v49 }
 0x25d   :  { %2275 = vmatprep.subr.bf16.mxu1 %v2375_v3 }
 0x260   :  { %2277 = vmatpush3.bf16.msra.mxu1 %v2481_v50 }
 0x261   :  { %2278 = vmatprep.subr.bf16.mxu1 %v2375_v3 }
 0x264   :  { %2280 = vmatpush3.bf16.msra.mxu1 %v2483_v51 }
 0x267   :  { %1991 = vmatmul.mubr.f32.vlgmr.msra.gmra.mrb[0].mxu1 %v2721_v62 }
 0x33a   :  { %v1338_v8 = vpop.f32.mrb[0].mxu1 }
 0x33b   :  { %v1342_v12 = vmul.f32 0.032258064, %v1338_v8  ;;  %v1992_v13 = vpop.f32.mrb[1].mxu1 }
 0x33d   :  { %2309 = vrsqrt.f32 %v1342_v12 }
 0x347   :  { %v2310_v22 = vpop.eup %2309 }
 0x348   :  { %v1347_v31 = vmul.f32 %v2310_v22, %v1346_v18 }
 0x34a   :  { %v1348_v44 = vmul.f32 %v1347_v31, %v2717_v59 }
 0x34c   :  { %v1350_v49 = vadd.f32 %v1349_v32, %v1348_v44 }
 0x34e   :  { %1351 = vst [vmem:[#allocation7] sm:$0xf] %v1350_v49 }
 0x34f   :  { %2354 = shalt.err (!%p2351_p1)
}
 0x350   :  { %s2355_s15 = scalar_lea.hbm %s2832_s3, 64 }
 0x351   :  { %p2356_p2 = scmp.ne.s32.totalorder %s2832_s3, %s2355_s15  ;;  %p2359_p3 = scmp.lt.u32.totalorder %s2355_s15, %s2832_s3 }
 0x353   :  { %p2361_p4 = pnand %p2359_p3, %p2356_p2 }
 0x355   :  { %2364 = shalt.err (!%p2361_p4)
}
 0x356   :  { %1361 = dma.vmem_to_hbm [thread:$0]  %s1359_s11, 64, %s2832_s3, [#allocation4]  }
 0x357   :  { %2369 = dma.done.wait [#allocation4], 64  }
 0x358   :  { %2370 = vsyncadd [#allocation4], 4294967232 }
 0x359   :  { %1365 = vsyncpa [#allocation3], 1 }
 0x35a   :  { %1366 = vsyncpa [#allocation4], 1 }
 0x35b   :  { %1367 = vsyncpa [#allocation5], 1 }

</bundles_post_ra>
